<compile_context>
chip_gen: v6e
topology: v6e:2x2x1
jax: 0.10.0
libtpu: 0.0.40
codegen_flags: <defaults>
</compile_context>

<pallas_src>
import numpy as np

import jax
import jax.numpy as jnp
from jax.experimental import pallas as pl
from jax.experimental.pallas import tpu as pltpu


def _make_segmented_max_kernel(seg_slices):
    """Build a kernel specialised to the (host-static) segment boundaries.

    seg_slices : tuple of (start, length) Python ints, one per packed segment.

    Kernel refs:
      x_ref : (n, s, D_TILE)         one lane tile of the full packed sequence
      o_ref : (num_segs, n, D_TILE)  per-segment max for this lane tile
    """

    def kernel(x_ref, o_ref):
        # Short static loop (num_segs is typically 2-8); each segment is a
        # STATIC slice of the seq axis -> no mask, no dynamic indexing, the
        # reduce is a plain vmax over exactly the segment's frames.
        for k, (st, ln) in enumerate(seg_slices):
            o_ref[k] = jnp.max(x_ref[:, st:st + ln, :], axis=1)

    return kernel


def _choose_d_tile(D, n, s, num_segs, itemsize, budget_bytes=12 * 1024 * 1024):
    """Largest lane-dense (multiple-of-128) divisor of D whose double-buffered
    working set (2 input blocks + 2 output blocks) fits `budget_bytes`.

    Keeps blocks large (>= 128 lanes, ideally MiB-scale) but bounded so the
    kernel fits v5e's 16 MiB / v7x's 32 MiB default scoped VMEM limits.
    """
    if D % 128 != 0:
        # Block dim equal to the full array dim is always legal; fall back.
        return D
    per_lane_bytes = 2 * (n * s + num_segs * n) * itemsize
    max_lanes = max(128, budget_bytes // max(per_lane_bytes, 1))
    m = D // 128
    best = 128
    for k in range(1, m + 1):
        if m % k == 0 and 128 * k <= max_lanes:
            best = 128 * k
    # TODO(synk): if n*s is so large that even a 128-lane block exceeds the
    # budget, the seq/batch axes would also need tiling (not needed for
    # GaitPart-scale shapes).
    return best


def pack_sequence_max_pool(seqs, seqL, seq_dim=1):
    """PackSequenceWrapper(torch.max).forward (values only), Pallas-backed.

    seqs: [n, s, ...] array; seqL: list/1-D array of segment lengths (or None).
    Returns [num_segments * n, ...] — torch.cat of the per-segment max over
    seq_dim (or the plain pooled [n, ...] when seqL is None).
    """
    if seq_dim != 1:
        seqs = jnp.moveaxis(seqs, seq_dim, 1)

    n, s = int(seqs.shape[0]), int(seqs.shape[1])
    feat_shape = tuple(int(d) for d in seqs.shape[2:])
    D = int(np.prod(feat_shape)) if feat_shape else 1
    x = seqs.reshape(n, s, D)

    # seqL is host-side data in the PyTorch module (.cpu().numpy().tolist()),
    # so segment starts/lengths are static Python ints at trace time.
    if seqL is None:
        seg_lens = [s]
    else:
        seg_lens = [int(v) for v in np.asarray(seqL).reshape(-1)]
    if any(L <= 0 for L in seg_lens):
        raise ValueError("PackSequenceWrapper: zero/negative-length segment.")
    if sum(seg_lens) > s:
        raise ValueError("PackSequenceWrapper: sum(seqL) exceeds sequence length.")
    seg_starts = [0] + [int(v) for v in np.cumsum(seg_lens)[:-1]]
    seg_slices = tuple(zip(seg_starts, seg_lens))
    num_segs = len(seg_lens)

    itemsize = jnp.dtype(x.dtype).itemsize
    d_tile = _choose_d_tile(D, n, s, num_segs, itemsize)
    num_d_tiles = D // d_tile

    cost = pl.CostEstimate(
        flops=n * s * D,  # ~one max-compare per input element
        transcendentals=0,
        bytes_accessed=(n * s * D + num_segs * n * D) * itemsize,
    )

    out = pl.pallas_call(
        _make_segmented_max_kernel(seg_slices),
        out_shape=jax.ShapeDtypeStruct((num_segs, n, D), x.dtype),
        grid=(num_d_tiles,),
        in_specs=[
            # Each grid step reads a disjoint lane tile of the whole packed
            # sequence -> disjoint HBM bytes per TensorCore under "parallel".
            pl.BlockSpec((n, s, d_tile), lambda d: (0, 0, d)),
        ],
        # All segments for this lane tile are written as one dense block.
        out_specs=pl.BlockSpec((num_segs, n, d_tile), lambda d: (0, 0, d)),
        compiler_params=pltpu.CompilerParams(
            dimension_semantics=("parallel",),
        ),
        cost_estimate=cost,
    )(x)

    # torch.cat(rets, dim=0): segment-major, then batch.
    return out.reshape((num_segs * n,) + feat_shape)


if __name__ == "__main__":
    key = jax.random.PRNGKey(0)

    # Small shapes consistent with the module: seqs [n, s, c, h, w].
    n, s, c, h, w = 2, 8, 4, 16, 16
    seqs = jax.random.normal(key, (n, s, c, h, w), dtype=jnp.float32)
    seqL = [3, 5]  # variable-length segments packed along the seq dim (sum == s)

    y = jax.block_until_ready(pack_sequence_max_pool(seqs, seqL, seq_dim=1))

    # Reference: PackSequenceWrapper(torch.max) semantics (values only).
    rets = []
    start = 0
    for L in seqL:
        rets.append(jnp.max(seqs[:, start:start + L], axis=1))
        start += L
    y_ref = jnp.concatenate(rets, axis=0)
    assert y.shape == y_ref.shape == (len(seqL) * n, c, h, w)
    assert jnp.allclose(y, y_ref, atol=1e-6, rtol=1e-6)

    # seqL=None path: pooling_func applied to the whole sequence.
    y_none = jax.block_until_ready(pack_sequence_max_pool(seqs, None))
    assert y_none.shape == (n, c, h, w)
    assert jnp.allclose(y_none, jnp.max(seqs, axis=1), atol=1e-6, rtol=1e-6)

    print("KERNEL_OK")
</pallas_src>

<mosaic_0001>
module attributes {stable_mosaic.version = 11 : i64} {
  func.func @kernel(%arg0: i32, %arg1: memref<2x8x1024xf32, #tpu.memory_space<vmem>>, %arg2: memref<2x2x1024xf32, #tpu.memory_space<vmem>>) attributes {dimension_semantics = [#tpu.dimension_semantics<parallel>], iteration_bounds = array<i64: 1>, scalar_prefetch = 0 : i64, scratch_operands = 0 : i64, tpu.core_type = #tpu.core_type<tc>, window_params = [{transform_indices = @transform_0, window_bounds = array<i64: 2, 8, 1024>}, {transform_indices = @transform_1, window_bounds = array<i64: 2, 2, 1024>}]} {
    %c0 = arith.constant 0 : index
    %c0_0 = arith.constant 0 : index
    %c0_1 = arith.constant 0 : index
    %0 = vector.load %arg1[%c0, %c0_0, %c0_1] : memref<2x8x1024xf32, #tpu.memory_space<vmem>>, vector<2x3x1024xf32>
    %cst = arith.constant dense<0xFF800000> : vector<2x1024xf32>
    %1 = vector.multi_reduction <maximumf>, %0, %cst [1] : vector<2x3x1024xf32> to vector<2x1024xf32>
    %c0_2 = arith.constant 0 : index
    %c0_3 = arith.constant 0 : index
    %c0_4 = arith.constant 0 : index
    %2 = vector.load %arg2[%c0_2, %c0_3, %c0_4] : memref<2x2x1024xf32, #tpu.memory_space<vmem>>, vector<1x2x1024xf32>
    %3 = vector.shape_cast %2 : vector<1x2x1024xf32> to vector<2x1024xf32>
    %4 = vector.shape_cast %1 : vector<2x1024xf32> to vector<1x2x1024xf32>
    tpu.vector_store %arg2[%c0_2, %c0_3, %c0_4], %4 {strides = array<i32>} : memref<2x2x1024xf32, #tpu.memory_space<vmem>>, vector<1x2x1024xf32>,
    %c0_5 = arith.constant 0 : index
    %c3 = arith.constant 3 : index
    %c0_6 = arith.constant 0 : index
    %5 = vector.load %arg1[%c0_5, %c3, %c0_6] : memref<2x8x1024xf32, #tpu.memory_space<vmem>>, vector<2x5x1024xf32>
    %cst_7 = arith.constant dense<0xFF800000> : vector<2x1024xf32>
    %6 = vector.multi_reduction <maximumf>, %5, %cst_7 [1] : vector<2x5x1024xf32> to vector<2x1024xf32>
    %c1 = arith.constant 1 : index
    %c0_8 = arith.constant 0 : index
    %c0_9 = arith.constant 0 : index
    %7 = vector.load %arg2[%c1, %c0_8, %c0_9] : memref<2x2x1024xf32, #tpu.memory_space<vmem>>, vector<1x2x1024xf32>
    %8 = vector.shape_cast %7 : vector<1x2x1024xf32> to vector<2x1024xf32>
    %9 = vector.shape_cast %6 : vector<2x1024xf32> to vector<1x2x1024xf32>
    tpu.vector_store %arg2[%c1, %c0_8, %c0_9], %9 {strides = array<i32>} : memref<2x2x1024xf32, #tpu.memory_space<vmem>>, vector<1x2x1024xf32>,
    return
  }
  func.func @transform_0(%arg0: i32) -> (i32, i32, i32) {
    %c0_i32 = arith.constant 0 : i32
    %c0_i32_0 = arith.constant 0 : i32
    %c0_i32_1 = arith.constant 0 : i32
    return %c0_i32, %c0_i32_0, %arg0 : i32, i32, i32
  }
  func.func @transform_1(%arg0: i32) -> (i32, i32, i32) {
    %c0_i32 = arith.constant 0 : i32
    %c0_i32_0 = arith.constant 0 : i32
    %c0_i32_1 = arith.constant 0 : i32
    return %c0_i32, %c0_i32_0, %arg0 : i32, i32, i32
  }
}

</mosaic_0001>

<bundles_post_ra>
// kernel: tpu_custom_call.1
= control target key start
LH: loop header
LB: loop body
LE: loop exit
PB: predicated region body
PF: predicated region fallthrough
CT: control target
= control target key end

     0   :  { %6 = vsyncpa [#allocation3], 0  ;;  %s658_s0 = inlined_call_operand.hbm [shape: f32[2,8,1024], index: 0, kind: input, shape index: {}]   ;;  %s659_s1 = inlined_call_operand.hbm [shape: f32[2,2,1024], index: 1, kind: output, shape index: {}]  }
   0x1   :  { %7 = vsyncpa [#allocation4], 0  ;;  %s560_s6 = smov [#allocation2]  }
   0x2   :  { %s13_s7 = sshll.u32 %s560_s6, 4  ;;  %s14_s7 = int_to_ptr.vmem [resolvable:$true] %s13_s7 }
   0x3   :  { %s524_s8 = scalar_lea.vmem %s14_s7, 2048  ;;  %p529_p1 = scmp.lt.s32.totalorder %s14_s7, %s14_s7 }
   0x4   :  { %p525_p0 = scmp.ne.s32.totalorder %s14_s7, %s524_s8  ;;  %p530_p2 = scmp.lt.s32.totalorder %s524_s8, %s524_s8 }
   0x6   :  { %p531_p3 = por %p530_p2, %p529_p1 }
   0x8   :  { %p532_p4 = pnand %p531_p3, %p525_p0 }
   0xa   :  { %535 = shalt.err (!%p532_p4)
}
   0xb   :  { %s561_s9 = smov 1024   ;;  %s562_s10 = smov 64  }
   0xc   :  { %19 = dma.hbm_to_vmem [thread:$0]  %s658_s0, 2048, %s14_s7, [#allocation3], %s561_s9, %s561_s9, %s562_s10  }
   0xd   :  { %556 = dma.done.wait [#allocation3], 2048  }
   0xe   :  { %557 = vsyncadd [#allocation3], 4294965248  ;;  %v563_v0 = vmov 1983009808   ;;  %v173_v2 = vlaneseq  ;;  %vm39_vm0 = vcmask 1042432   ;;  %vm241_vm1 = vcmask 1041409  }
   0xf   :  { %v171_v1 = vunpack.c.l.s4 %v563_v0  ;;  %v23_v5 = vld [vmem:[#allocation2] sm:$0x7]  ;;  %v24_v6 = vld [vmem:[#allocation2 + $0x8] sm:$0x7]  ;;  %v25_v7 = vld [vmem:[#allocation2 + $0x10] sm:$0x7] }
  0x10   :  { %v174_v4 = vshrl.u32 %v173_v2, 7  ;;  %v26_v8 = vld [vmem:[#allocation2 + $0x18] sm:$0x7]  ;;  %v31_v9 = vld [vmem:[#allocation2 + $0x40] sm:$0x7]  ;;  %v40_v12 = vsel %vm39_vm0, %v23_v5, -inf }
  0x11   :  { %v172_v3 = vunpack.c.0.s8 %v171_v1  ;;  %v32_v10 = vld [vmem:[#allocation2 + $0x48] sm:$0x7]  ;;  %v33_v11 = vld [vmem:[#allocation2 + $0x50] sm:$0x7]  ;;  %v47_v13 = vsel %vm39_vm0, %v24_v6, -inf  ;;  %v41_v16 = vrot.slane %v40_v12, 4 }
  0x12   :  { %v34_v15 = vld [vmem:[#allocation2 + $0x58] sm:$0x7]  ;;  %v48_v17 = vrot.slane %v47_v13, 4  ;;  %v54_v18 = vsel %vm39_vm0, %v25_v7, -inf  ;;  %v61_v19 = vsel %vm39_vm0, %v26_v8, -inf  ;;  %v96_v22 = vsel %vm39_vm0, %v31_v9, -inf }
  0x13   :  { %v582_v14 = vsub.s32 %v172_v3, %v174_v4  ;;  %v55_v20 = vrot.slane %v54_v18, 4  ;;  %v62_v21 = vrot.slane %v61_v19, 4  ;;  %v103_v23 = vsel %vm39_vm0, %v32_v10, -inf  ;;  %v27_v56 = vld [vmem:[#allocation2 + $0x20] sm:$0x7]  ;;  %s564_s0 = smov [#allocation5]  }
  0x14   :  { %v42_v24 = vmax.f32 %v40_v12, %v41_v16  ;;  %v49_v25 = vmax.f32 %v47_v13, %v48_v17  ;;  %v97_v26 = vrot.slane %v96_v22, 4  ;;  %v104_v27 = vrot.slane %v103_v23, 4  ;;  %v28_v1 = vld [vmem:[#allocation2 + $0x28] sm:$0x7]  ;;  %v29_v2 = vld [vmem:[#allocation2 + $0x30] sm:$0x7] }
  0x15   :  { %v56_v28 = vmax.f32 %v54_v18, %v55_v20  ;;  %v63_v29 = vmax.f32 %v61_v19, %v62_v21  ;;  %v110_v30 = vsel %vm39_vm0, %v33_v11, -inf  ;;  %v117_v31 = vsel %vm39_vm0, %v34_v15, -inf  ;;  %v30_v10 = vld [vmem:[#allocation2 + $0x38] sm:$0x7]  ;;  %v35_v20 = vld [vmem:[#allocation2 + $0x60] sm:$0x7] }
  0x16   :  { %v43_v32 = vrot.slane %v42_v24, 2  ;;  %v50_v33 = vrot.slane %v49_v25, 2  ;;  %v98_v34 = vmax.f32 %v96_v22, %v97_v26  ;;  %v105_v35 = vmax.f32 %v103_v23, %v104_v27  ;;  %v36_v21 = vld [vmem:[#allocation2 + $0x68] sm:$0x7]  ;;  %s497_s13 = sshll.u32 %s564_s0, 4  ;;  %s498_s13 = int_to_ptr.vmem [resolvable:$true] %s497_s13 }
  0x17   :  { %v57_v36 = vrot.slane %v56_v28, 2  ;;  %v64_v37 = vrot.slane %v63_v29, 2  ;;  %v111_v38 = vrot.slane %v110_v30, 4  ;;  %v118_v39 = vrot.slane %v117_v31, 4  ;;  %s536_s14 = scalar_lea.vmem %s498_s13, 512  ;;  %p541_p6 = scmp.lt.s32.totalorder %s498_s13, %s498_s13 }
  0x18   :  { %v44_v40 = vmax.f32 %v42_v24, %v43_v32  ;;  %v51_v41 = vmax.f32 %v49_v25, %v50_v33  ;;  %v99_v42 = vrot.slane %v98_v34, 2  ;;  %v106_v43 = vrot.slane %v105_v35, 2  ;;  %p537_p5 = scmp.ne.s32.totalorder %s498_s13, %s536_s14  ;;  %p542_p7 = scmp.lt.s32.totalorder %s536_s14, %s536_s14 }
  0x19   :  { %v58_v44 = vmax.f32 %v56_v28, %v57_v36  ;;  %v65_v45 = vmax.f32 %v63_v29, %v64_v37  ;;  %v112_v46 = vmax.f32 %v110_v30, %v111_v38  ;;  %v119_v47 = vmax.f32 %v117_v31, %v118_v39  ;;  %v37_v29 = vld [vmem:[#allocation2 + $0x70] sm:$0x7] }
  0x1a   :  { %v45_v48 = vrot.slane %v44_v40, 1  ;;  %v52_v49 = vrot.slane %v51_v41, 1  ;;  %v100_v50 = vmax.f32 %v98_v34, %v99_v42  ;;  %v107_v51 = vmax.f32 %v105_v35, %v106_v43  ;;  %p543_p8 = por %p542_p7, %p541_p6 }
  0x1b   :  { %v59_v52 = vrot.slane %v58_v44, 1  ;;  %v66_v53 = vrot.slane %v65_v45, 1  ;;  %v113_v54 = vrot.slane %v112_v46, 2  ;;  %v120_v55 = vrot.slane %v119_v47, 2 }
  0x1c   :  { %v46_v57 = vmax.f32 %v44_v40, %v45_v48  ;;  %v53_v58 = vmax.f32 %v51_v41, %v52_v49  ;;  %v101_v59 = vrot.slane %v100_v50, 1  ;;  %v108_v60 = vrot.slane %v107_v51, 1  ;;  %v38_v48 = vld [vmem:[#allocation2 + $0x78] sm:$0x7]  ;;  %p544_p9 = pnand %p543_p8, %p537_p5 }
  0x1d   :  { %v60_v61 = vmax.f32 %v58_v44, %v59_v52  ;;  %v67_v62 = vmax.f32 %v65_v45, %v66_v53  ;;  %v114_v63 = vmax.f32 %v112_v46, %v113_v54  ;;  %v121_v0 = vmax.f32 %v119_v47, %v120_v55 }
  0x1e   :  { %v102_v3 = vmax.f32 %v100_v50, %v101_v59  ;;  %v109_v4 = vmax.f32 %v107_v51, %v108_v60  ;;  %v168_v5 = vcombine.low %v46_v57, %v53_v58  ;;  %v68_v6 = vsel %vm39_vm0, %v27_v56, -inf }
  0x1f   :  { %v115_v7 = vrot.slane %v114_v63, 1  ;;  %v122_v8 = vrot.slane %v121_v0, 1  ;;  %v169_v9 = vcombine.low %v60_v61, %v67_v62  ;;  %v69_v11 = vrot.slane %v68_v6, 4 }
  0x20   :  { %v176_v12 = vrot.slane %v168_v5, %v582_v14  ;;  %v202_v13 = vcombine.low %v102_v3, %v109_v4  ;;  %v75_v15 = vsel %vm39_vm0, %v28_v1, -inf  ;;  %v82_v16 = vsel %vm39_vm0, %v29_v2, -inf  ;;  %v260_v5 = vld [vmem:[#allocation2] sm:$0xf8] }
  0x21   :  { %v116_v17 = vmax.f32 %v114_v63, %v115_v7  ;;  %v123_v18 = vmax.f32 %v121_v0, %v122_v8  ;;  %v183_v19 = vrot.slane %v169_v9, %v582_v14  ;;  %vm243_vm2 = vcmask 1043459  }
  0x22   :  { %v70_v22 = vmax.f32 %v68_v6, %v69_v11  ;;  %v210_v23 = vrot.slane %v202_v13, %v582_v14  ;;  %vm245_vm3 = vcmask 1045509   ;;  %v76_v24 = vrot.slane %v75_v15, 4 }
  0x23   :  { %v83_v25 = vrot.slane %v82_v16, 4  ;;  %v89_v26 = vsel %vm39_vm0, %v30_v10, -inf  ;;  %v184_v27 = vcombine.low %v176_v12, %v183_v19  ;;  %v203_v28 = vcombine.low %v116_v17, %v123_v18 }
  0x24   :  { %vm247_vm4 = vcmask 1047559   ;;  %v71_v30 = vrot.slane %v70_v22, 2  ;;  %v90_v31 = vrot.slane %v89_v26, 4  ;;  %v77_v32 = vmax.f32 %v75_v15, %v76_v24  ;;  %v261_v15 = vld [vmem:[#allocation2 + $0x8] sm:$0xf8] }
  0x25   :  { %v84_v33 = vmax.f32 %v82_v16, %v83_v25  ;;  %v124_v34 = vsel %vm39_vm0, %v35_v20, -inf  ;;  %v131_v35 = vsel %vm39_vm0, %v36_v21, -inf  ;;  %v217_v36 = vrot.slane %v203_v28, %v582_v14  ;;  %v262_v16 = vld [vmem:[#allocation2 + $0x10] sm:$0xf8]  ;;  %v263_v24 = vld [vmem:[#allocation2 + $0x18] sm:$0xf8] }
  0x26   :  { %v72_v37 = vmax.f32 %v70_v22, %v71_v30  ;;  %v91_v38 = vmax.f32 %v89_v26, %v90_v31  ;;  %v125_v39 = vrot.slane %v124_v34, 4  ;;  %v78_v40 = vrot.slane %v77_v32, 2 }
  0x27   :  { %v85_v41 = vrot.slane %v84_v33, 2  ;;  %v132_v42 = vrot.slane %v131_v35, 4  ;;  %v138_v43 = vsel %vm39_vm0, %v37_v29, -inf  ;;  %vm276_vm5 = vcmask 1047555  }
  0x28   :  { %v218_v44 = vcombine.low %v210_v23, %v217_v36  ;;  %v73_v45 = vrot.slane %v72_v37, 1  ;;  %v92_v46 = vrot.slane %v91_v38, 2  ;;  %v126_v47 = vmax.f32 %v124_v34, %v125_v39 }
  0x29   :  { %v79_v49 = vmax.f32 %v77_v32, %v78_v40  ;;  %v86_v50 = vmax.f32 %v84_v33, %v85_v41  ;;  %v133_v51 = vmax.f32 %v131_v35, %v132_v42  ;;  %v139_v52 = vrot.slane %v138_v43, 4  ;;  %v268_v32 = vld [vmem:[#allocation2 + $0x40] sm:$0xf8]  ;;  %v269_v33 = vld [vmem:[#allocation2 + $0x48] sm:$0xf8] }
  0x2a   :  { %v240_v53 = vrot.slane %v218_v44, 7  ;;  %v74_v54 = vmax.f32 %v72_v37, %v73_v45  ;;  %v93_v55 = vmax.f32 %v91_v38, %v92_v46  ;;  %v127_v56 = vrot.slane %v126_v47, 2  ;;  %v270_v42 = vld [vmem:[#allocation2 + $0x50] sm:$0xf8] }
  0x2b   :  { %v80_v57 = vrot.slane %v79_v49, 1  ;;  %v87_v58 = vrot.slane %v86_v50, 1  ;;  %v134_v59 = vrot.slane %v133_v51, 2  ;;  %v140_v60 = vmax.f32 %v138_v43, %v139_v52 }
  0x2c   :  { %v242_v61 = vsel %vm241_vm1, %v240_v53, %v184_v27  ;;  %v94_v62 = vrot.slane %v93_v55, 1  ;;  %v128_v63 = vmax.f32 %v126_v47, %v127_v56  ;;  %v145_v0 = vsel %vm39_vm0, %v38_v48, -inf }
  0x2d   :  { %v244_v1 = vsel %vm243_vm2, %v240_v53, %v242_v61  ;;  %v81_v2 = vmax.f32 %v79_v49, %v80_v57  ;;  %v88_v3 = vmax.f32 %v86_v50, %v87_v58  ;;  %v135_v4 = vmax.f32 %v133_v51, %v134_v59  ;;  %v271_v61 = vld [vmem:[#allocation2 + $0x58] sm:$0xf8] }
  0x2e   :  { %v246_v6 = vsel %vm245_vm3, %v240_v53, %v244_v1  ;;  %v95_v7 = vmax.f32 %v93_v55, %v94_v62  ;;  %v129_v8 = vrot.slane %v128_v63, 1  ;;  %v141_v9 = vrot.slane %v140_v60, 2 }
  0x2f   :  { %v248_v10 = vsel %vm247_vm4, %v240_v53, %v246_v6  ;;  %v136_v11 = vrot.slane %v135_v4, 1  ;;  %v146_v12 = vrot.slane %v145_v0, 4  ;;  %v185_v13 = vcombine.low %v74_v54, %v81_v2 }
  0x30   :  { %258 = vst [vmem:[#allocation5] sm:$0xff] %v248_v10  ;;  %v130_v17 = vmax.f32 %v128_v63, %v129_v8  ;;  %v142_v18 = vmax.f32 %v140_v60, %v141_v9  ;;  %v186_v19 = vcombine.low %v88_v3, %v95_v7  ;;  %v277_v20 = vsel %vm276_vm5, %v260_v5, -inf }
  0x31   :  { %v137_v21 = vmax.f32 %v135_v4, %v136_v11  ;;  %v147_v22 = vmax.f32 %v145_v0, %v146_v12  ;;  %v608_v23 = vrot.slane %v185_v13, %v582_v14  ;;  %v278_v25 = vrot.slane %v277_v20, 4 }
  0x32   :  { %v143_v26 = vrot.slane %v142_v18, 1  ;;  %v611_v27 = vrot.slane %v186_v19, %v582_v14  ;;  %v284_v28 = vsel %vm276_vm5, %v261_v15, -inf  ;;  %v291_v29 = vsel %vm276_vm5, %v262_v16, -inf  ;;  %v264_v15 = vld [vmem:[#allocation2 + $0x20] sm:$0xf8] }
  0x33   :  { %v148_v30 = vrot.slane %v147_v22, 2  ;;  %v219_v31 = vcombine.low %v130_v17, %v137_v21  ;;  %v279_v34 = vmax.f32 %v277_v20, %v278_v25  ;;  %v285_v35 = vrot.slane %v284_v28, 4 }
  0x34   :  { %v144_v36 = vmax.f32 %v142_v18, %v143_v26  ;;  %v201_v37 = vcombine.low %v608_v23, %v611_v27  ;;  %v292_v38 = vrot.slane %v291_v29, 4  ;;  %v298_v39 = vsel %vm276_vm5, %v263_v24, -inf }
  0x35   :  { %v149_v40 = vmax.f32 %v147_v22, %v148_v30  ;;  %v227_v41 = vrot.slane %v219_v31, %v582_v14  ;;  %v280_v43 = vrot.slane %v279_v34, 2  ;;  %v286_v44 = vmax.f32 %v284_v28, %v285_v35  ;;  %v266_v30 = vld [vmem:[#allocation2 + $0x30] sm:$0xf8] }
  0x36   :  { %v293_v45 = vmax.f32 %v291_v29, %v292_v38  ;;  %v299_v46 = vrot.slane %v298_v39, 4  ;;  %v333_v47 = vsel %vm276_vm5, %v268_v32, -inf  ;;  %v340_v48 = vsel %vm276_vm5, %v269_v33, -inf  ;;  %v265_v29 = vld [vmem:[#allocation2 + $0x28] sm:$0xf8] }
  0x37   :  { %v150_v49 = vrot.slane %v149_v40, 1  ;;  %v281_v50 = vmax.f32 %v279_v34, %v280_v43  ;;  %v287_v51 = vrot.slane %v286_v44, 2  ;;  %v334_v52 = vrot.slane %v333_v47, 4 }
  0x38   :  { %v294_v53 = vrot.slane %v293_v45, 2  ;;  %v300_v54 = vmax.f32 %v298_v39, %v299_v46  ;;  %v341_v55 = vrot.slane %v340_v48, 4  ;;  %v347_v56 = vsel %vm276_vm5, %v270_v42, -inf }
  0x39   :  { %v151_v57 = vmax.f32 %v149_v40, %v150_v49  ;;  %v282_v58 = vrot.slane %v281_v50, 1  ;;  %v288_v59 = vmax.f32 %v286_v44, %v287_v51  ;;  %v335_v60 = vmax.f32 %v333_v47, %v334_v52  ;;  %v267_v47 = vld [vmem:[#allocation2 + $0x38] sm:$0xf8]  ;;  %v273_v51 = vld [vmem:[#allocation2 + $0x68] sm:$0xf8] }
  0x3a   :  { %v295_v62 = vmax.f32 %v293_v45, %v294_v53  ;;  %v301_v63 = vrot.slane %v300_v54, 2  ;;  %v342_v0 = vmax.f32 %v340_v48, %v341_v55  ;;  %v348_v1 = vrot.slane %v347_v56, 4 }
  0x3b   :  { %v220_v2 = vcombine.low %v144_v36, %v151_v57  ;;  %v283_v3 = vmax.f32 %v281_v50, %v282_v58  ;;  %v289_v4 = vrot.slane %v288_v59, 1  ;;  %v336_v5 = vrot.slane %v335_v60, 2  ;;  %v272_v50 = vld [vmem:[#allocation2 + $0x60] sm:$0xf8] }
  0x3c   :  { %v296_v6 = vrot.slane %v295_v62, 1  ;;  %v302_v7 = vmax.f32 %v300_v54, %v301_v63  ;;  %v343_v8 = vrot.slane %v342_v0, 2  ;;  %v349_v9 = vmax.f32 %v347_v56, %v348_v1  ;;  %v274_v56 = vld [vmem:[#allocation2 + $0x70] sm:$0xf8] }
  0x3d   :  { %v234_v10 = vrot.slane %v220_v2, %v582_v14  ;;  %v290_v11 = vmax.f32 %v288_v59, %v289_v4  ;;  %v337_v12 = vmax.f32 %v335_v60, %v336_v5  ;;  %v354_v13 = vsel %vm276_vm5, %v271_v61, -inf }
  0x3e   :  { %v297_v16 = vmax.f32 %v295_v62, %v296_v6  ;;  %v303_v17 = vrot.slane %v302_v7, 1  ;;  %v344_v18 = vmax.f32 %v342_v0, %v343_v8  ;;  %v350_v19 = vrot.slane %v349_v9, 2 }
  0x3f   :  { %v235_v20 = vcombine.low %v227_v41, %v234_v10  ;;  %v338_v21 = vrot.slane %v337_v12, 1  ;;  %v355_v22 = vrot.slane %v354_v13, 4  ;;  %v405_v24 = vcombine.low %v283_v3, %v290_v11 }
  0x40   :  { %v304_v25 = vmax.f32 %v302_v7, %v303_v17  ;;  %v345_v26 = vrot.slane %v344_v18, 1  ;;  %v351_v28 = vmax.f32 %v349_v9, %v350_v19  ;;  %v305_v31 = vsel %vm276_vm5, %v264_v15, -inf }
  0x41   :  { %v251_v32 = vrot.slane %v235_v20, 7  ;;  %v339_v33 = vmax.f32 %v337_v12, %v338_v21  ;;  %v356_v34 = vmax.f32 %v354_v13, %v355_v22  ;;  %v306_v39 = vrot.slane %v305_v31, 4  ;;  %v275_v12 = vld [vmem:[#allocation2 + $0x78] sm:$0xf8] }
  0x42   :  { %v346_v35 = vmax.f32 %v344_v18, %v345_v26  ;;  %v352_v36 = vrot.slane %v351_v28, 1  ;;  %v406_v38 = vcombine.low %v297_v16, %v304_v25  ;;  %v312_v42 = vsel %vm276_vm5, %v265_v29, -inf }
  0x43   :  { %v252_v40 = vsel %vm241_vm1, %v251_v32, %v201_v37  ;;  %v357_v41 = vrot.slane %v356_v34, 2  ;;  %v319_v43 = vsel %vm276_vm5, %v266_v30, -inf  ;;  %v413_v46 = vrot.slane %v405_v24, %v582_v14 }
  0x44   :  { %v253_v44 = vsel %vm243_vm2, %v251_v32, %v252_v40  ;;  %v353_v45 = vmax.f32 %v351_v28, %v352_v36  ;;  %v307_v52 = vmax.f32 %v305_v31, %v306_v39  ;;  %v313_v23 = vrot.slane %v312_v42, 4 }
  0x45   :  { %v254_v48 = vsel %vm245_vm3, %v251_v32, %v253_v44  ;;  %v358_v49 = vmax.f32 %v356_v34, %v357_v41  ;;  %v420_v37 = vrot.slane %v406_v38, %v582_v14  ;;  %v439_v53 = vcombine.low %v339_v33, %v346_v35 }
  0x46   :  { %v255_v27 = vsel %vm247_vm4, %v251_v32, %v254_v48  ;;  %v320_v54 = vrot.slane %v319_v43, 4  ;;  %v308_v57 = vrot.slane %v307_v52, 2  ;;  %v314_v58 = vmax.f32 %v312_v42, %v313_v23 }
  0x47   :  { %259 = vst [vmem:[#allocation5 + $0x8] sm:$0xff] %v255_v27  ;;  %v359_v55 = vrot.slane %v358_v49, 1  ;;  %v326_v59 = vsel %vm276_vm5, %v267_v47, -inf  ;;  %v361_v62 = vsel %vm276_vm5, %v272_v50, -inf  ;;  %v368_v63 = vsel %vm276_vm5, %v273_v51, -inf }
  0x48   :  { %v321_v60 = vmax.f32 %v319_v43, %v320_v54  ;;  %v327_v61 = vrot.slane %v326_v59, 4  ;;  %v309_v1 = vmax.f32 %v307_v52, %v308_v57  ;;  %v315_v2 = vrot.slane %v314_v58, 2 }
  0x49   :  { %v360_v0 = vmax.f32 %v358_v49, %v359_v55  ;;  %v362_v3 = vrot.slane %v361_v62, 4  ;;  %v369_v6 = vrot.slane %v368_v63, 4  ;;  %v375_v7 = vsel %vm276_vm5, %v274_v56, -inf }
  0x4a   :  { %v322_v4 = vrot.slane %v321_v60, 2  ;;  %v328_v5 = vmax.f32 %v326_v59, %v327_v61  ;;  %v447_v9 = vrot.slane %v439_v53, %v582_v14  ;;  %v316_v10 = vmax.f32 %v314_v58, %v315_v2 }
  0x4b   :  { %v440_v8 = vcombine.low %v353_v45, %v360_v0  ;;  %v363_v11 = vmax.f32 %v361_v62, %v362_v3  ;;  %v370_v16 = vmax.f32 %v368_v63, %v369_v6  ;;  %v376_v17 = vrot.slane %v375_v7, 4 }
  0x4c   :  { %v323_v13 = vmax.f32 %v321_v60, %v322_v4  ;;  %v329_v15 = vrot.slane %v328_v5, 2  ;;  %v421_v18 = vcombine.low %v413_v46, %v420_v37  ;;  %v310_v21 = vrot.slane %v309_v1, 1 }
  0x4d   :  { %v454_v19 = vrot.slane %v440_v8, %v582_v14  ;;  %v364_v20 = vrot.slane %v363_v11, 2  ;;  %v371_v24 = vrot.slane %v370_v16, 2  ;;  %v377_v25 = vmax.f32 %v375_v7, %v376_v17 }
  0x4e   :  { %v330_v22 = vmax.f32 %v328_v5, %v329_v15  ;;  %v317_v28 = vrot.slane %v316_v10, 1  ;;  %v382_v30 = vsel %vm276_vm5, %v275_v12, -inf  ;;  %v324_v31 = vrot.slane %v323_v13, 1 }
  0x4f   :  { %v455_v26 = vcombine.low %v447_v9, %v454_v19  ;;  %v365_v29 = vmax.f32 %v363_v11, %v364_v20  ;;  %v372_v33 = vmax.f32 %v370_v16, %v371_v24  ;;  %v378_v34 = vrot.slane %v377_v25, 2 }
  0x50   :  { %v331_v32 = vrot.slane %v330_v22, 1  ;;  %v383_v38 = vrot.slane %v382_v30, 4  ;;  %v311_v42 = vmax.f32 %v309_v1, %v310_v21  ;;  %v318_v43 = vmax.f32 %v316_v10, %v317_v28 }
  0x51   :  { %v475_v35 = vrot.slane %v455_v26, 7  ;;  %v366_v36 = vrot.slane %v365_v29, 1  ;;  %v373_v39 = vrot.slane %v372_v33, 1  ;;  %v379_v40 = vmax.f32 %v377_v25, %v378_v34 }
  0x52   :  { %v384_v44 = vmax.f32 %v382_v30, %v383_v38  ;;  %v325_v46 = vmax.f32 %v323_v13, %v324_v31  ;;  %v332_v47 = vmax.f32 %v330_v22, %v331_v32  ;;  %v422_v37 = vcombine.low %v311_v42, %v318_v43 }
  0x53   :  { %v476_v41 = vsel %vm241_vm1, %v475_v35, %v421_v18  ;;  %v367_v48 = vmax.f32 %v365_v29, %v366_v36  ;;  %v374_v50 = vmax.f32 %v372_v33, %v373_v39  ;;  %v380_v51 = vrot.slane %v379_v40, 1 }
  0x54   :  { %v477_v45 = vsel %vm243_vm2, %v475_v35, %v476_v41  ;;  %v385_v52 = vrot.slane %v384_v44, 2  ;;  %v423_v55 = vcombine.low %v325_v46, %v332_v47  ;;  %v430_v58 = vrot.slane %v422_v37, %v582_v14 }
  0x55   :  { %v478_v49 = vsel %vm245_vm3, %v475_v35, %v477_v45  ;;  %v381_v53 = vmax.f32 %v379_v40, %v380_v51  ;;  %v456_v56 = vcombine.low %v367_v48, %v374_v50 }
  0x56   :  { %v479_v23 = vsel %vm247_vm4, %v475_v35, %v478_v49  ;;  %v386_v27 = vmax.f32 %v384_v44, %v385_v52  ;;  %v437_v59 = vrot.slane %v423_v55, %v582_v14 }
  0x57   :  { %490 = vst [vmem:[#allocation5 + $0x10] sm:$0xff] %v479_v23  ;;  %v464_v61 = vrot.slane %v456_v56, %v582_v14 }
  0x58   :  { %v387_v54 = vrot.slane %v386_v27, 1  ;;  %v438_v63 = vcombine.low %v430_v58, %v437_v59 }
  0x5a   :  { %v388_v57 = vmax.f32 %v386_v27, %v387_v54 }
  0x5c   :  { %v457_v60 = vcombine.low %v381_v53, %v388_v57 }
  0x5e   :  { %v471_v62 = vrot.slane %v457_v60, %v582_v14 }
  0x60   :  { %v472_v0 = vcombine.low %v464_v61, %v471_v62 }
  0x62   :  { %v482_v1 = vrot.slane %v472_v0, 7 }
  0x64   :  { %v483_v2 = vsel %vm241_vm1, %v482_v1, %v438_v63 }
  0x65   :  { %v484_v3 = vsel %vm243_vm2, %v482_v1, %v483_v2 }
  0x66   :  { %v485_v4 = vsel %vm245_vm3, %v482_v1, %v484_v3 }
  0x67   :  { %v486_v5 = vsel %vm247_vm4, %v482_v1, %v485_v4 }
  0x68   :  { %491 = vst [vmem:[#allocation5 + $0x18] sm:$0xff] %v486_v5 }
  0x69   :  { %547 = shalt.err (!%p544_p9)
}
  0x6a   :  { %s565_s15 = smov 256   ;;  %s566_s16 = smov 16  }
  0x6b   :  { %503 = dma.vmem_to_hbm [thread:$0]  %s498_s13, 512, %s659_s1, [#allocation4], %s565_s15, %s565_s15, %s566_s16  }
  0x6c   :  { %558 = dma.done.wait [#allocation4], 512  }
  0x6d   :  { %559 = vsyncadd [#allocation4], 4294966784 }
  0x6e   :  { %507 = vsyncpa [#allocation3], 1 }
  0x6f   :  { %508 = vsyncpa [#allocation4], 1 }

</bundles_post_ra>
